<compile_context>
chip_gen: v5e
topology: v5e:2x2
jax: 0.10.0
libtpu: 0.0.40
codegen_flags: <defaults>
</compile_context>

<pallas_src>
import jax
import jax.numpy as jnp
from jax import lax
from jax.experimental import pallas as pl
from jax.experimental.pallas import tpu as pltpu


def _selfattn_kernel(x_ref, wq_ref, bq_ref, wk_ref, bk_ref, wv_ref, bv_ref,
                     gamma_ref, o_ref):
    # x_ref: (C, N) channels-first block for the current batch element
    # (leading batch dim squeezed away by the BlockSpec).
    x = x_ref[...]                                                   # (C, N) f32

    # 1x1 convs == channel matmuls in PyTorch weight layout (Cout, Cin):
    #   q = Wq @ x + bq  -> (C8, N);  k -> (C8, N);  v = Wv @ x + bv -> (C, N)
    q = jnp.dot(wq_ref[...], x, preferred_element_type=jnp.float32) + bq_ref[...]
    k = jnp.dot(wk_ref[...], x, preferred_element_type=jnp.float32) + bk_ref[...]
    v = jnp.dot(wv_ref[...], x, preferred_element_type=jnp.float32) + bv_ref[...]

    # energy[i, j] = <q[:, i], k[:, j]>  -> (N, N).
    # dot_general contracts the matching C8 axes directly (no materialized .T).
    # Kept in f32: K = C8 is tiny, so bf16 buys nothing on this contraction.
    energy = lax.dot_general(
        q, k, dimension_numbers=(((0,), (0,)), ((), ())),
        preferred_element_type=jnp.float32)                          # (N, N)

    # torch.nn.Softmax(dim=-2): normalize over the FIRST axis (each column of
    # `energy` sums to 1).  Stats are per-column (indexed by k); f32 math.
    m = jnp.max(energy, axis=0, keepdims=True)                       # (1, N)
    e = jnp.exp(energy - m)                                          # (N, N)
    inv_denom = pl.reciprocal(jnp.sum(e, axis=0, keepdims=True), approx=True)

    # out[c, j] = sum_k v[c, k] * attn[j, k]
    #           = sum_k (v[c, k] * inv_denom[k]) * e[j, k]
    # Folding the reciprocal into v (C x N) is cheaper than scaling the (N x N)
    # attention matrix, and the contraction stays in the MXU-native
    # transpose-rhs form.  bf16 operands + f32 accumulation for MXU throughput.
    v_scaled = (v * inv_denom).astype(jnp.bfloat16)                  # (C, N)
    out = lax.dot_general(
        v_scaled, e.astype(jnp.bfloat16),
        dimension_numbers=(((1,), (1,)), ((), ())),
        preferred_element_type=jnp.float32)                          # (C, N)

    gamma = gamma_ref[0]                                             # scalar (SMEM)
    o_ref[...] = gamma * out + x


def self_attention_pallas(x_nchw, wq, bq, wk, bk, wv, bv, gamma):
    """x_nchw: (B, C, W, H) float32.  Weights in PyTorch Conv2d layout:
       wq/wk: (C//8, C, 1, 1), wv: (C, C, 1, 1), biases: (Cout,), gamma: scalar."""
    B, C, W, H = x_nchw.shape
    N = W * H
    C8 = C // 8

    # NCHW -> (B, C, N): a pure reshape of contiguous memory (no HBM transpose).
    x_bcn = x_nchw.reshape(B, C, N).astype(jnp.float32)

    # Conv2d weights (Cout, Cin, 1, 1) -> (Cout, Cin); biases as columns (Cout, 1).
    wq2 = wq.reshape(C8, C).astype(jnp.float32)
    wk2 = wk.reshape(C8, C).astype(jnp.float32)
    wv2 = wv.reshape(C, C).astype(jnp.float32)
    bq2 = bq.reshape(C8, 1).astype(jnp.float32)
    bk2 = bk.reshape(C8, 1).astype(jnp.float32)
    bv2 = bv.reshape(C, 1).astype(jnp.float32)
    gamma1 = jnp.reshape(gamma, (1,)).astype(jnp.float32)

    full2d = lambda b: (0, 0)
    out_bcn = pl.pallas_call(
        _selfattn_kernel,
        out_shape=jax.ShapeDtypeStruct((B, C, N), jnp.float32),
        grid_spec=pltpu.PrefetchScalarGridSpec(
            num_scalar_prefetch=0,
            grid=(B,),
            in_specs=[
                pl.BlockSpec((None, C, N), lambda b: (b, 0, 0)),      # x, lane-dense over N
                pl.BlockSpec((C8, C), full2d),                        # Wq
                pl.BlockSpec((C8, 1), full2d),                        # bq
                pl.BlockSpec((C8, C), full2d),                        # Wk
                pl.BlockSpec((C8, 1), full2d),                        # bk
                pl.BlockSpec((C, C), full2d),                         # Wv
                pl.BlockSpec((C, 1), full2d),                         # bv
                pl.BlockSpec(memory_space=pltpu.MemorySpace.SMEM),    # gamma scalar
            ],
            out_specs=pl.BlockSpec((None, C, N), lambda b: (b, 0, 0)),
        ),
        compiler_params=pltpu.CompilerParams(
            # batch axis is independent -> megacore-shardable (both v7x TCs busy).
            dimension_semantics=("parallel",),
            # Headroom for larger N; trivially satisfied at the test shape.
            vmem_limit_bytes=64 * 1024 * 1024,
        ),
    )(x_bcn, wq2, bq2, wk2, bk2, wv2, bv2, gamma1)

    # (B, C, N) -> NCHW, again a free reshape.
    return out_bcn.reshape(B, C, W, H)


def self_attention_ref(x_nchw, wq, bq, wk, bk, wv, bv, gamma):
    """Pure-JAX f32 reference mirroring the PyTorch forward exactly."""
    B, C, W, H = x_nchw.shape
    N = W * H
    C8 = C // 8
    x_flat = x_nchw.reshape(B, C, N)                                    # (B, C, N)
    q = jnp.einsum("oc,bcn->bon", wq.reshape(C8, C), x_flat) + bq[None, :, None]
    k = jnp.einsum("oc,bcn->bon", wk.reshape(C8, C), x_flat) + bk[None, :, None]
    v = jnp.einsum("oc,bcn->bon", wv.reshape(C, C), x_flat) + bv[None, :, None]
    query = jnp.transpose(q, (0, 2, 1))                                 # (B, N, C8)
    energy = jnp.einsum("bic,bcj->bij", query, k)                       # (B, N, N)
    attention = jax.nn.softmax(energy, axis=-2)                         # dim=-2
    out = jnp.einsum("bck,bjk->bcj", v, attention)                      # bmm(v, attn^T)
    out = out.reshape(B, C, W, H)
    return gamma * out + x_nchw


if __name__ == "__main__":
    B, C, W, H = 2, 16, 16, 16   # in_dim=16 -> query/key channels = 2; N = 256
    C8 = C // 8

    key = jax.random.PRNGKey(0)
    keys = jax.random.split(key, 8)
    x = jax.random.normal(keys[0], (B, C, W, H), dtype=jnp.float32)
    wq = jax.random.normal(keys[1], (C8, C, 1, 1), dtype=jnp.float32) * 0.1
    bq = jax.random.normal(keys[2], (C8,), dtype=jnp.float32) * 0.1
    wk = jax.random.normal(keys[3], (C8, C, 1, 1), dtype=jnp.float32) * 0.1
    bk = jax.random.normal(keys[4], (C8,), dtype=jnp.float32) * 0.1
    wv = jax.random.normal(keys[5], (C, C, 1, 1), dtype=jnp.float32) * 0.1
    bv = jax.random.normal(keys[6], (C,), dtype=jnp.float32) * 0.1
    # Module init is gamma=0 (identity output); use a nonzero deterministic
    # value so the attention path is actually exercised.
    gamma = jnp.float32(0.5)

    out = jax.block_until_ready(
        self_attention_pallas(x, wq, bq, wk, bk, wv, bv, gamma))
    ref = jax.block_until_ready(
        self_attention_ref(x, wq, bq, wk, bk, wv, bv, gamma))

    assert out.shape == (B, C, W, H)
    # Tolerance accounts for bf16 operands (f32 accumulation) in the attn@V
    # contraction and the approximate EUP reciprocal; reference is pure f32.
    assert jnp.allclose(out, ref, atol=1e-2, rtol=1e-2), float(
        jnp.max(jnp.abs(out - ref)))
    print("KERNEL_OK")
</pallas_src>

<mosaic_0001>
module attributes {stable_mosaic.version = 11 : i64} {
  func.func @_selfattn_kernel(%arg0: i32, %arg1: memref<1x16x256xf32, #tpu.memory_space<vmem>>, %arg2: memref<2x16xf32, #tpu.memory_space<vmem>>, %arg3: memref<2x1xf32, #tpu.memory_space<vmem>>, %arg4: memref<2x16xf32, #tpu.memory_space<vmem>>, %arg5: memref<2x1xf32, #tpu.memory_space<vmem>>, %arg6: memref<16x16xf32, #tpu.memory_space<vmem>>, %arg7: memref<16x1xf32, #tpu.memory_space<vmem>>, %arg8: memref<1xf32, #tpu.memory_space<smem>>, %arg9: memref<1x16x256xf32, #tpu.memory_space<vmem>>) attributes {dimension_semantics = [#tpu.dimension_semantics<parallel>], iteration_bounds = array<i64: 2>, scalar_prefetch = 0 : i64, scratch_operands = 0 : i64, tpu.core_type = #tpu.core_type<tc>, window_params = [{transform_indices = @transform_0, window_bounds = array<i64: 1, 16, 256>}, {pipeline_mode = #tpu.pipeline_mode<synchronous>, transform_indices = @transform_1, window_bounds = array<i64: 2, 16>}, {pipeline_mode = #tpu.pipeline_mode<synchronous>, transform_indices = @transform_2, window_bounds = array<i64: 2, 1>}, {pipeline_mode = #tpu.pipeline_mode<synchronous>, transform_indices = @transform_3, window_bounds = array<i64: 2, 16>}, {pipeline_mode = #tpu.pipeline_mode<synchronous>, transform_indices = @transform_4, window_bounds = array<i64: 2, 1>}, {pipeline_mode = #tpu.pipeline_mode<synchronous>, transform_indices = @transform_5, window_bounds = array<i64: 16, 16>}, {pipeline_mode = #tpu.pipeline_mode<synchronous>, transform_indices = @transform_6, window_bounds = array<i64: 16, 1>}, {transform_indices = @transform_7, window_bounds = array<i64: 1>}, {transform_indices = @transform_8, window_bounds = array<i64: 1, 16, 256>}]} {
    %c0 = arith.constant 0 : index
    %c0_0 = arith.constant 0 : index
    %c0_1 = arith.constant 0 : index
    %0 = vector.load %arg1[%c0, %c0_0, %c0_1] : memref<1x16x256xf32, #tpu.memory_space<vmem>>, vector<1x16x256xf32>
    %1 = vector.shape_cast %0 : vector<1x16x256xf32> to vector<16x256xf32>
    %c0_2 = arith.constant 0 : index
    %c0_3 = arith.constant 0 : index
    %2 = vector.load %arg2[%c0_2, %c0_3] : memref<2x16xf32, #tpu.memory_space<vmem>>, vector<2x16xf32>
    %cst = arith.constant dense<0.000000e+00> : vector<2x256xf32>
    %3 = tpu.matmul %2, %1, %cst {dimension_numbers = #tpu.dot_dimension_numbers<[1], [0], [0], [1], [0, 0, 1, 1], [], []>} : vector<2x16xf32>, vector<16x256xf32>, vector<2x256xf32> -> vector<2x256xf32>
    %c0_4 = arith.constant 0 : index
    %c0_5 = arith.constant 0 : index
    %4 = vector.load %arg3[%c0_4, %c0_5] : memref<2x1xf32, #tpu.memory_space<vmem>>, vector<2x1xf32>
    %5 = vector.broadcast %4 : vector<2x1xf32> to vector<2x256xf32>
    %6 = arith.addf %3, %5 : vector<2x256xf32>
    %c0_6 = arith.constant 0 : index
    %c0_7 = arith.constant 0 : index
    %7 = vector.load %arg4[%c0_6, %c0_7] : memref<2x16xf32, #tpu.memory_space<vmem>>, vector<2x16xf32>
    %cst_8 = arith.constant dense<0.000000e+00> : vector<2x256xf32>
    %8 = tpu.matmul %7, %1, %cst_8 {dimension_numbers = #tpu.dot_dimension_numbers<[1], [0], [0], [1], [0, 0, 1, 1], [], []>} : vector<2x16xf32>, vector<16x256xf32>, vector<2x256xf32> -> vector<2x256xf32>
    %c0_9 = arith.constant 0 : index
    %c0_10 = arith.constant 0 : index
    %9 = vector.load %arg5[%c0_9, %c0_10] : memref<2x1xf32, #tpu.memory_space<vmem>>, vector<2x1xf32>
    %10 = vector.broadcast %9 : vector<2x1xf32> to vector<2x256xf32>
    %11 = arith.addf %8, %10 : vector<2x256xf32>
    %c0_11 = arith.constant 0 : index
    %c0_12 = arith.constant 0 : index
    %12 = vector.load %arg6[%c0_11, %c0_12] : memref<16x16xf32, #tpu.memory_space<vmem>>, vector<16x16xf32>
    %cst_13 = arith.constant dense<0.000000e+00> : vector<16x256xf32>
    %13 = tpu.matmul %12, %1, %cst_13 {dimension_numbers = #tpu.dot_dimension_numbers<[1], [0], [0], [1], [0, 0, 1, 1], [], []>} : vector<16x16xf32>, vector<16x256xf32>, vector<16x256xf32> -> vector<16x256xf32>
    %c0_14 = arith.constant 0 : index
    %c0_15 = arith.constant 0 : index
    %14 = vector.load %arg7[%c0_14, %c0_15] : memref<16x1xf32, #tpu.memory_space<vmem>>, vector<16x1xf32>
    %15 = vector.broadcast %14 : vector<16x1xf32> to vector<16x256xf32>
    %16 = arith.addf %13, %15 : vector<16x256xf32>
    %cst_16 = arith.constant dense<0.000000e+00> : vector<256x256xf32>
    %17 = tpu.matmul %6, %11, %cst_16 {dimension_numbers = #tpu.dot_dimension_numbers<[0], [0], [1], [1], [0, 1, 1, 1], [], []>} : vector<2x256xf32>, vector<2x256xf32>, vector<256x256xf32> -> vector<256x256xf32>
    %cst_17 = arith.constant dense<0xFF800000> : vector<256xf32>
    %18 = vector.multi_reduction <maximumf>, %17, %cst_17 [0] : vector<256x256xf32> to vector<256xf32>
    %19 = vector.shape_cast %18 : vector<256xf32> to vector<1x256xf32>
    %20 = vector.broadcast %19 : vector<1x256xf32> to vector<256x256xf32>
    %21 = arith.subf %17, %20 : vector<256x256xf32>
    %22 = math.exp %21 : vector<256x256xf32>
    %cst_18 = arith.constant dense<0.000000e+00> : vector<256xf32>
    %23 = vector.multi_reduction <add>, %22, %cst_18 [0] : vector<256x256xf32> to vector<256xf32>
    %24 = vector.shape_cast %23 : vector<256xf32> to vector<1x256xf32>
    %25 = tpu.reciprocal %24 {approx = true} : vector<1x256xf32> -> vector<1x256xf32>
    %26 = vector.broadcast %25 : vector<1x256xf32> to vector<16x256xf32>
    %27 = arith.mulf %16, %26 : vector<16x256xf32>
    %28 = arith.truncf %27 : vector<16x256xf32> to vector<16x256xbf16>
    %29 = arith.truncf %22 : vector<256x256xf32> to vector<256x256xbf16>
    %cst_19 = arith.constant dense<0.000000e+00> : vector<16x256xf32>
    %30 = tpu.matmul %28, %29, %cst_19 {dimension_numbers = #tpu.dot_dimension_numbers<[1], [1], [0], [0], [0, 0, 1, 0], [], []>} : vector<16x256xbf16>, vector<256x256xbf16>, vector<16x256xf32> -> vector<16x256xf32>
    %c0_20 = arith.constant 0 : index
    %31 = memref.load %arg8[%c0_20] : memref<1xf32, #tpu.memory_space<smem>>
    %32 = vector.broadcast %31 : f32 to vector<16x256xf32>
    %33 = arith.mulf %32, %30 : vector<16x256xf32>
    %34 = arith.addf %33, %1 : vector<16x256xf32>
    %c0_21 = arith.constant 0 : index
    %c0_22 = arith.constant 0 : index
    %c0_23 = arith.constant 0 : index
    %35 = vector.load %arg9[%c0_21, %c0_22, %c0_23] : memref<1x16x256xf32, #tpu.memory_space<vmem>>, vector<1x16x256xf32>
    %36 = vector.shape_cast %35 : vector<1x16x256xf32> to vector<16x256xf32>
    %37 = vector.shape_cast %34 : vector<16x256xf32> to vector<1x16x256xf32>
    tpu.vector_store %arg9[%c0_21, %c0_22, %c0_23], %37 {strides = array<i32>} : memref<1x16x256xf32, #tpu.memory_space<vmem>>, vector<1x16x256xf32>,
    return
  }
  func.func @transform_0(%arg0: i32) -> (i32, i32, i32) {
    %c0_i32 = arith.constant 0 : i32
    %c0_i32_0 = arith.constant 0 : i32
    %c0_i32_1 = arith.constant 0 : i32
    return %arg0, %c0_i32, %c0_i32_0 : i32, i32, i32
  }
  func.func @transform_1(%arg0: i32) -> (i32, i32) {
    %c0_i32 = arith.constant 0 : i32
    %c0_i32_0 = arith.constant 0 : i32
    %c0_i32_1 = arith.constant 0 : i32
    return %c0_i32, %c0_i32_0 : i32, i32
  }
  func.func @transform_2(%arg0: i32) -> (i32, i32) {
    %c0_i32 = arith.constant 0 : i32
    %c0_i32_0 = arith.constant 0 : i32
    %c0_i32_1 = arith.constant 0 : i32
    return %c0_i32, %c0_i32_0 : i32, i32
  }
  func.func @transform_3(%arg0: i32) -> (i32, i32) {
    %c0_i32 = arith.constant 0 : i32
    %c0_i32_0 = arith.constant 0 : i32
    %c0_i32_1 = arith.constant 0 : i32
    return %c0_i32, %c0_i32_0 : i32, i32
  }
  func.func @transform_4(%arg0: i32) -> (i32, i32) {
    %c0_i32 = arith.constant 0 : i32
    %c0_i32_0 = arith.constant 0 : i32
    %c0_i32_1 = arith.constant 0 : i32
    return %c0_i32, %c0_i32_0 : i32, i32
  }
  func.func @transform_5(%arg0: i32) -> (i32, i32) {
    %c0_i32 = arith.constant 0 : i32
    %c0_i32_0 = arith.constant 0 : i32
    %c0_i32_1 = arith.constant 0 : i32
    return %c0_i32, %c0_i32_0 : i32, i32
  }
  func.func @transform_6(%arg0: i32) -> (i32, i32) {
    %c0_i32 = arith.constant 0 : i32
    %c0_i32_0 = arith.constant 0 : i32
    %c0_i32_1 = arith.constant 0 : i32
    return %c0_i32, %c0_i32_0 : i32, i32
  }
  func.func @transform_7(%arg0: i32) -> i32 {
    %c0_i32 = arith.constant 0 : i32
    %c0_i32_0 = arith.constant 0 : i32
    return %c0_i32 : i32
  }
  func.func @transform_8(%arg0: i32) -> (i32, i32, i32) {
    %c0_i32 = arith.constant 0 : i32
    %c0_i32_0 = arith.constant 0 : i32
    %c0_i32_1 = arith.constant 0 : i32
    return %arg0, %c0_i32, %c0_i32_0 : i32, i32, i32
  }
}

</mosaic_0001>

<bundles_post_ra>
// kernel: tpu_custom_call.1
= control target key start
LH: loop header
LB: loop body
LE: loop exit
PB: predicated region body
PF: predicated region fallthrough
CT: control target
= control target key end

     0   :  { %s2720_s0 = inlined_call_operand.hbm [shape: f32[2,16,256], index: 0, kind: input, shape index: {}]   ;;  %s2721_s1 = inlined_call_operand.vmem [shape: f32[2,16], index: 1, kind: input, shape index: {}]   ;;  %s2722_s2 = inlined_call_operand.vmem [shape: f32[2,1], index: 2, kind: input, shape index: {}]   ;;  %s2723_s3 = inlined_call_operand.vmem [shape: f32[2,16], index: 3, kind: input, shape index: {}]   ;;  %s2724_s4 = inlined_call_operand.vmem [shape: f32[2,1], index: 4, kind: input, shape index: {}]   ;;  %s2725_s5 = inlined_call_operand.vmem [shape: f32[16,16], index: 5, kind: input, shape index: {}]   ;;  %s2726_s6 = inlined_call_operand.vmem [shape: f32[16,1], index: 6, kind: input, shape index: {}]   ;;  %s2727_s7 = inlined_call_operand.<no memory space> [shape: f32[1], index: 7, kind: input, shape index: {}]   ;;  %s2728_s8 = inlined_call_operand.hbm [shape: f32[2,16,256], index: 8, kind: output, shape index: {}]  }
   0x1   :  { %13 = sst [smem:[#allocation2]] %s2727_s7 }
   0x2   :  { %14 = vsyncpa [#allocation4], 0 }
   0x3   :  { %16 = vsyncpa [#allocation4 + $0x1], 0 }
   0x4   :  { %17 = vsyncpa [#allocation5], 0 }
   0x5   :  { %19 = vsyncpa [#allocation5 + $0x1], 0  ;;  %s1864_s29 = smov 0   ;;  %s1866_s30 = smov 0  }
   0x6   :  { %s1868_s9 = smov 0   ;;  %s1870_s10 = smov 0  }
   0x7 LB: > { %s1885_s7 = sadd.s32 4294967295, %s1809_s10   ;;  %s1431_s11 = sadd.s32 4294967294, %s1809_s10   ;;  %s1809_s10 = sphi %s1870_s10, %s2839_s10   ;;  %s1805_s9 = sphi %s1868_s9, %s2838_s9   ;;  %s1801_s30 = sphi %s1866_s30, %s2837_s30   ;;  %s1797_s29 = sphi %s1864_s29, %s2836_s29  }
   0x8   : > { %s1889_s12 = sadd.s32 1, %s1809_s10   ;;  %s32_s13 = sadd.s32 1, %s1805_s9 }
   0x9   : > { %s29_s14 = ssub.s32 %s1809_s10, %s1889_s12  ;;  %p39_p0 = scmp.ne.s32.totalorder %s1805_s9, %s1801_s30 }
   0xa   : > { %p30_p1 = scmp.eq.s32.totalorder %s29_s14, 0  ;;  %p40_p2 = scmp.eq.s32.totalorder %s1809_s10, 0 }
   0xb   : > { %p45_p3 = scmp.ne.s32.totalorder %s1801_s30, %s1797_s29  ;;  %p46_p4 = scmp.eq.s32.totalorder %s1885_s7, 0 }
   0xc   : > { %s1901_s15 = scalar_select %p30_p1, %s1805_s9, %s32_s13  }
   0xd   : > { %p1903_p5 = por %p40_p2, %p39_p0  ;;  %p1907_p6 = por %p46_p4, %p45_p3 }
   0xe   : > { %2753 = sst [smem:[#allocation9_spill]] %s1901_s15  ;;  %p216_p7 = scmp.eq.s32.totalorder %s1885_s7, 1 }
   0xf   : > { %p222_p8 = scmp.eq.s32.totalorder %s1431_s11, 1  ;;  %p1535_p10 = scmp.lt.s32.totalorder %s1809_s10, 2 }
  0x10   : > { %p1914_p11 = por %p216_p7, %p39_p0  ;;  %s263_s20 = sand.u32 1, %s1805_s9  }
  0x11   : > { %p1918_p12 = por %p222_p8, %p45_p3  ;;  %s1519_s21 = sshll.u32 %s1809_s10, 5 }
  0x12   : > { %s1434_s22 = sshll.u32 %s263_s20, 5  ;;  %s272_s25 = scalar_lea.hbm %s2720_s0, %s1519_s21 }
  0x13   : > { %s273_s26 = sshll.u32 %s272_s25, 4  ;;  %s267_s27 = scalar_lea.vmem [#allocation3], %s1434_s22  ;;  %s274_s26 = int_to_ptr.hbm [resolvable:$true] %s273_s26 }
  0x14   : > { %s275_s28 = sshll.u32 %s267_s27, 4  ;;  %p1929_p13 = pnand %p1535_p10, %p1903_p5  ;;  %s276_s28 = int_to_ptr.vmem [resolvable:$true] %s275_s28 }
  0x15   : > { %p1437_p0 = scmp.ge.s32.totalorder %s1809_s10, 1  ;;  %p283_p1 = scmp.lt.s32.totalorder %s1809_s10, 3 }
  0x16   : > { %s264_s13 = scalar_lea.sflag [#allocation4], %s263_s20  ;;  %s1713_s14 = sshra.s32 %s274_s26, 4  ;;  %s1714_s14 = int_to_ptr.hbm [resolvable:$true] %s1713_s14 }
  0x17   : > { %s1715_s15 = scalar_lea.hbm %s1714_s14, 32  ;;  %p1717_p3 = pneg %p1929_p13 }
  0x18   : > { %p1716_p2 = scmp.ne.s32.totalorder %s1714_s14, %s1715_s15  ;;  %s1720_s16 = scalar_lea.hbm %s2720_s0, 64 }
  0x19   : > { %p1721_p5 = scmp.lt.s32.totalorder %s1714_s14, %s2720_s0  ;;  %p1722_p8 = scmp.lt.s32.totalorder %s1720_s16, %s1715_s15 }
  0x1a   : > { %p1718_p4 = pnand %p1717_p3, %p1716_p2 }
  0x1b   : > { %p1723_p10 = por %p1722_p8, %p1721_p5 }
  0x1c   : > { %p1719_p7 = pneg %p1718_p4 }
  0x1e   : > { %p1724_p9 = pnand %p1723_p10, %p1719_p7 }
  0x20   : > { %1727 = shalt.err (!%p1724_p9)
}
  0x21   : > { %s1811_s20 = smov 256   ;;  %s1812_s25 = smov 16  }
  0x22   : > { %1530 = dma.hbm_to_vmem [thread:$0]  (!%p1929_p13), %s274_s26, 512, %s276_s28, %s264_s13, %s1811_s20, %s1811_s20, %s1812_s25  }
  0x23   : > { %p284_p2 = pnand %p1437_p0, %p283_p1 }
  0x25   : > { %287 = sbr.rel (%p284_p2) target bundleno = 1071 (0x42f), region = 52 }
  0x2a   : > { %s1950_s27 = sand.u32 1, %s1801_s30  }
  0x2b   : > { %s1438_s15 = sshll.u32 %s1950_s27, 5  ;;  %s290_s14 = scalar_lea.sflag [#allocation4], %s1950_s27 }
  0x2c   : > { %s1956_s21 = scalar_lea.vmem [#allocation3], %s1438_s15 }
  0x2d   : > { %1788 = dma.done.wait (%p1907_p6), %s290_s14, 512  }
  0x2e   : > { %1790 = vsyncadd (%p1907_p6), %s290_s14, 4294966784  ;;  %v1813_v0 = vmov 0   ;;  %v329_v1 = vld [vmem:[%s1956_s21 + $0x10] sm:$0xff]  ;;  %v330_v2 = vld [vmem:[%s1956_s21 + $0x18] sm:$0xff]  ;;  %vm338_vm0 = vcmask 130048   ;;  %vm659_vm1 = vcmask 1041408  }
  0x2f   : > { %1575 = vset.pattern.permute.xlu0 %v1813_v0  ;;  %1576 = vset.pattern.permute.xlu2 %v1813_v0  ;;  %v327_v3 = vld [vmem:[%s1956_s21] sm:$0xff]  ;;  %v328_v4 = vld [vmem:[%s1956_s21 + $0x8] sm:$0xff]  ;;  %vm562_vm2 = vcmask 15360   ;;  %s1328_s13 = sld [smem:[#allocation2]]  ;;  %s326_s22 = scalar_lea.vmem [#allocation6], %s1438_s15 }
  0x30   : > { %356 = vmatpush.msra.mxu0 %v329_v1  ;;  %376 = vmatpush.msra.mxu1 %v330_v2  ;;  %v331_v5 = vld [vmem:[%s2721_s1] sm:$0x3]  ;;  %v433_v18 = vld [vmem:[%s2725_s5 + $0x8] sm:$0xff]  ;;  %s1520_s16 = sshll.u32 %s1885_s7, 5  ;;  %s1355_s20 = sshll.u32 %s326_s22, 4  ;;  %s1356_s20 = int_to_ptr.vmem [resolvable:$true] %s1355_s20 }
  0x31   : > { %426 = vmatpush.msra.mxu3 %v330_v2  ;;  %v382_v6 = vld [vmem:[%s2723_s3] sm:$0x3]  ;;  %v435_v42 = vld [vmem:[%s2726_s6 + $0x8] sm:$0xff]  ;;  %s1354_s24 = scalar_lea.hbm %s2728_s8, %s1520_s16  ;;  %s1343_s7 = scalar_lea.sflag [#allocation5], %s1950_s27 }
  0x32   : > { %357 = vmatpush.msra.mxu0 %v327_v3  ;;  %377 = vmatpush.msra.mxu1 %v328_v4  ;;  %v332_v7 = vld [vmem:[%s2722_s2] sm:$0x3]  ;;  %s1357_s25 = sshll.u32 %s1354_s24, 4  ;;  %s1763_s11 = scalar_lea.hbm %s2728_s8, 64  ;;  %s1358_s25 = int_to_ptr.hbm [resolvable:$true] %s1357_s25 }
  0x33   : > { %427 = vmatpush.msra.mxu3 %v328_v4  ;;  %1440 = vmatmul.msk.f32.vlgmr.msra.gmra.mxu0 %vm338_vm0, %v331_v5  ;;  %v383_v8 = vld [vmem:[%s2724_s4] sm:$0x3]  ;;  %s1757_s14 = sshra.s32 %s1358_s25, 4  ;;  %s1758_s14 = int_to_ptr.hbm [resolvable:$true] %s1757_s14 }
  0x34   : > { %1441 = vmatmul.msk.f32.vlgmr.msra.gmra.mxu1 %vm338_vm0, %v331_v5  ;;  %1443 = vmatmul.msk.f32.vlgmr.msra.gmra.mxu3 %vm338_vm0, %v382_v6  ;;  %v432_v17 = vld [vmem:[%s2725_s5] sm:$0xff]  ;;  %s1759_s26 = scalar_lea.hbm %s1758_s14, 32  ;;  %p1764_p0 = scmp.lt.s32.totalorder %s1758_s14, %s2728_s8 }
  0x35   : > { %335 = vperm.xlu0 %1575, %v332_v7   ;;  %406 = vmatpush.msrb.mxu0 %v329_v1  ;;  %v434_v40 = vld [vmem:[%s2726_s6] sm:$0xff]  ;;  %p1760_p6 = scmp.ne.s32.totalorder %s1758_s14, %s1759_s26  ;;  %p1765_p1 = scmp.lt.s32.totalorder %s1763_s11, %s1759_s26 }
  0x36   : > { %489 = vmatpush.msrb.mxu1 %v330_v2  ;;  %438 = vperm.xlu2 %1576, %v434_v40  }
  0x37   : > { %407 = vmatpush.msrb.mxu0 %v327_v3  ;;  %p1761_p9 = pnand %p1760_p6, %p1914_p11  ;;  %p1766_p3 = por %p1765_p1, %p1764_p0 }
  0x38   : > { %490 = vmatpush.msrb.mxu1 %v328_v4 }
  0x39   : > { %466 = vmatpush.msra.mxu0 %v329_v1  ;;  %p1762_p13 = pneg %p1761_p9 }
  0x3b   : > { %467 = vmatpush.msra.mxu0 %v327_v3  ;;  %p1767_p4 = pnand %p1766_p3, %p1762_p13 }
  0x3c   : > { %1442 = vmatmul.msk.f32.vlgmr.msrb.gmra.mxu0 %vm338_vm0, %v382_v6  ;;  %1446 = vmatmul.msk.f32.vlgmr.msrb.gmra.mxu1 %vm338_vm0, %v432_v17 }
  0x3d   : > { %386 = vperm.xlu0 %1575, %v383_v8  }
  0x3e   : > { %443 = vperm.xlu2 %1576, %v435_v42  }
  0x44   : > { %1444 = vmatmul.msk.f32.vlgmr.msra.gmra.mxu0 %vm338_vm0, %v432_v17  ;;  %1447 = vmatmul.msk.f32.gmra.mxu1 %vm338_vm0, %v433_v18 }
  0x4c   : > { %1445 = vmatmul.msk.f32.gmra.mxu0 %vm338_vm0, %v433_v18 }
  0xa7   : > { %v336_v9 = vpop.permute.xlu0 %335 }
  0xaf   : > { %v387_v12 = vpop.permute.xlu0 %386 }
  0xb0   : > { %v359_v10 = vpop.f32.mrf.mxu0 }
  0xb1   : > { %v360_v11 = vadd.f32 %v359_v10, %v336_v9  ;;  %v379_v19 = vpop.f32.mrf.mxu1 }
  0xb2   : > { %v380_v20 = vadd.f32 %v379_v19, %v336_v9 }
  0xb3   : > { %498 = vxpose.xlu1.b32.start.end [1/1] (short) %v360_v11, 128 }
  0xb7   : > { %v429_v13 = vpop.f32.mrf.mxu3 }
  0xb8   : > { %v430_v14 = vadd.f32 %v429_v13, %v387_v12 }
  0xb9   : > { %v409_v15 = vpop.f32.mrf.mxu0  ;;  %v2090_v5 = vpop.f32.mrf.mxu1 }
  0xba   : > { %v410_v16 = vadd.f32 %v409_v15, %v387_v12  ;;  %1481 = vmatpush.msk.msra.mxu1 %vm659_vm1, %v430_v14  ;;  %1522 = vmatpush.msk.msrb.mxu3 %vm659_vm1, %v430_v14  ;;  %2764 = vst [vmem:[#allocation15_spill] sm:$0xff] %v2090_v5 }
  0xbc   : > { %1448 = vmatpush.msk.msrb.mxu0 %vm659_vm1, %v410_v16  ;;  %1521 = vmatpush.msk.msra.mxu2 %vm659_vm1, %v410_v16 }
  0xc1   : > { %v2096_v8 = vpop.f32.mrf.mxu0  ;;  %v2102_v11 = vpop.f32.mrf.mxu1 }
  0xc2   : > { %2765 = vst [vmem:[#allocation16_spill] sm:$0xff] %v2096_v8 }
  0xc3   : > { %2767 = vst [vmem:[#allocation18_spill] sm:$0xff] %v2102_v11 }
  0xc9   : > { %v2104_v12 = vpop.f32.mrf.mxu0 }
  0xca   : > { %2768 = vst [vmem:[#allocation19_spill] sm:$0xff] %v2104_v12 }
 0x133   : > { %530 = vxpose.xlu1.b32.start.end [1/1] (short) %v380_v20, 128 }
 0x157   : > { %v514_v21 = vpop.trf.xlu1 }
 0x158   : > { %1449 = vmatmul.msk.f32.vlgmr.msrb.gmra.mxu0 %vm562_vm2, %v514_v21  ;;  %1482 = vmatmul.msk.f32.vlgmr.msra.gmra.mxu1 %vm562_vm2, %v514_v21 }
 0x15f   : > { %v515_v22 = vpop.trf.xlu1 }
 0x160   : > { %1450 = vmatmul.msk.f32.gmra.mxu0 %vm562_vm2, %v515_v22  ;;  %1483 = vmatmul.msk.f32.gmra.mxu1 %vm562_vm2, %v515_v22 }
 0x167   : > { %v516_v23 = vpop.trf.xlu1 }
 0x168   : > { %1451 = vmatmul.msk.f32.gmra.mxu0 %vm562_vm2, %v516_v23  ;;  %1484 = vmatmul.msk.f32.gmra.mxu1 %vm562_vm2, %v516_v23 }
 0x16f   : > { %v517_v24 = vpop.trf.xlu1 }
 0x170   : > { %1452 = vmatmul.msk.f32.gmra.mxu0 %vm562_vm2, %v517_v24  ;;  %1485 = vmatmul.msk.f32.gmra.mxu1 %vm562_vm2, %v517_v24 }
 0x177   : > { %v518_v25 = vpop.trf.xlu1 }
 0x178   : > { %1453 = vmatmul.msk.f32.gmra.mxu0 %vm562_vm2, %v518_v25  ;;  %1486 = vmatmul.msk.f32.gmra.mxu1 %vm562_vm2, %v518_v25 }
 0x17f   : > { %v519_v26 = vpop.trf.xlu1 }
 0x180   : > { %1454 = vmatmul.msk.f32.gmra.mxu0 %vm562_vm2, %v519_v26  ;;  %1487 = vmatmul.msk.f32.gmra.mxu1 %vm562_vm2, %v519_v26 }
 0x187   : > { %v520_v27 = vpop.trf.xlu1 }
 0x188   : > { %1455 = vmatmul.msk.f32.gmra.mxu0 %vm562_vm2, %v520_v27  ;;  %1488 = vmatmul.msk.f32.gmra.mxu1 %vm562_vm2, %v520_v27 }
 0x18f   : > { %v521_v28 = vpop.trf.xlu1 }
 0x190   : > { %1456 = vmatmul.msk.f32.gmra.mxu0 %vm562_vm2, %v521_v28  ;;  %1489 = vmatmul.msk.f32.gmra.mxu1 %vm562_vm2, %v521_v28 }
 0x197   : > { %v522_v29 = vpop.trf.xlu1 }
 0x198   : > { %1457 = vmatmul.msk.f32.vlgmr.msra.gmra.mxu2 %vm562_vm2, %v522_v29  ;;  %1490 = vmatmul.msk.f32.gmra.mxu1 %vm562_vm2, %v522_v29 }
 0x19f   : > { %v523_v30 = vpop.trf.xlu1 }
 0x1a0   : > { %1458 = vmatmul.msk.f32.gmra.mxu2 %vm562_vm2, %v523_v30  ;;  %1491 = vmatmul.msk.f32.gmra.mxu1 %vm562_vm2, %v523_v30 }
 0x1a7   : > { %v524_v31 = vpop.trf.xlu1 }
 0x1a8   : > { %1459 = vmatmul.msk.f32.gmra.mxu2 %vm562_vm2, %v524_v31  ;;  %1492 = vmatmul.msk.f32.vlgmr.msrb.gmra.mxu3 %vm562_vm2, %v524_v31 }
 0x1af   : > { %v525_v32 = vpop.trf.xlu1 }
 0x1b0   : > { %1460 = vmatmul.msk.f32.gmra.mxu2 %vm562_vm2, %v525_v32  ;;  %1493 = vmatmul.msk.f32.gmra.mxu3 %vm562_vm2, %v525_v32 }
 0x1b7   : > { %v526_v33 = vpop.trf.xlu1 }
 0x1b8   : > { %1461 = vmatmul.msk.f32.gmra.mxu2 %vm562_vm2, %v526_v33  ;;  %1494 = vmatmul.msk.f32.gmra.mxu3 %vm562_vm2, %v526_v33 }
 0x1bf   : > { %v527_v34 = vpop.trf.xlu1 }
 0x1c0   : > { %1462 = vmatmul.msk.f32.gmra.mxu2 %vm562_vm2, %v527_v34  ;;  %1495 = vmatmul.msk.f32.gmra.mxu3 %vm562_vm2, %v527_v34 }
 0x1c7   : > { %v528_v35 = vpop.trf.xlu1 }
 0x1c8   : > { %1463 = vmatmul.msk.f32.gmra.mxu2 %vm562_vm2, %v528_v35  ;;  %1496 = vmatmul.msk.f32.gmra.mxu3 %vm562_vm2, %v528_v35 }
 0x1cf   : > { %v529_v36 = vpop.trf.xlu1 }
 0x1d0   : > { %1464 = vmatmul.msk.f32.gmra.mxu2 %vm562_vm2, %v529_v36  ;;  %1497 = vmatmul.msk.f32.gmra.mxu3 %vm562_vm2, %v529_v36 }
 0x1d5   : > { %v2110_v15 = vpop.f32.mrf.mxu1  ;;  %v2112_v16 = vpop.f32.mrf.mxu0 }
 0x1d7   : > { %v546_v37 = vpop.trf.xlu1 }
 0x1d8   : > { %1465 = vmatmul.msk.f32.gmra.mxu2 %vm562_vm2, %v546_v37  ;;  %1498 = vmatmul.msk.f32.gmra.mxu3 %vm562_vm2, %v546_v37 }
 0x1dd   : > { %v2118_v19 = vpop.f32.mrf.mxu1  ;;  %v2124_v22 = vpop.f32.mrf.mxu0 }
 0x1de   : > { %2769 = vst [vmem:[#allocation20_spill] sm:$0xff] %v2124_v22 }
 0x1df   : > { %v547_v38 = vpop.trf.xlu1 }
 0x1e0   : > { %1466 = vmatmul.msk.f32.gmra.mxu2 %vm562_vm2, %v547_v38  ;;  %1499 = vmatmul.msk.f32.gmra.mxu3 %vm562_vm2, %v547_v38 }
 0x1e5   : > { %v2126_v23 = vpop.f32.mrf.mxu1  ;;  %v2132_v26 = vpop.f32.mrf.mxu0 }
 0x1e6   : > { %2770 = vst [vmem:[#allocation21_spill] sm:$0xff] %v2126_v23 }
 0x1e7   : > { %v548_v39 = vpop.trf.xlu1  ;;  %2771 = vst [vmem:[#allocation22_spill] sm:$0xff] %v2132_v26 }
 0x1e8   : > { %1467 = vmatmul.msk.f32.gmra.mxu2 %vm562_vm2, %v548_v39  ;;  %1500 = vmatmul.msk.f32.gmra.mxu3 %vm562_vm2, %v548_v39 }
 0x1ed   : > { %v2138_v29 = vpop.f32.mrf.mxu1  ;;  %v2140_v30 = vpop.f32.mrf.mxu0 }
 0x1ee   : > { %2772 = vst [vmem:[#allocation23_spill] sm:$0xff] %v2138_v29 }
 0x1ef   : > { %v549_v41 = vpop.trf.xlu1  ;;  %2773 = vst [vmem:[#allocation24_spill] sm:$0xff] %v2140_v30 }
 0x1f0   : > { %1468 = vmatmul.msk.f32.gmra.mxu2 %vm562_vm2, %v549_v41  ;;  %1501 = vmatmul.msk.f32.gmra.mxu3 %vm562_vm2, %v549_v41 }
 0x1f5   : > { %v2146_v33 = vpop.f32.mrf.mxu1  ;;  %v2148_v34 = vpop.f32.mrf.mxu0 }
 0x1f7   : > { %v550_v43 = vpop.trf.xlu1 }
 0x1f8   : > { %1469 = vmatmul.msk.f32.gmra.mxu2 %vm562_vm2, %v550_v43  ;;  %1502 = vmatmul.msk.f32.gmra.mxu3 %vm562_vm2, %v550_v43 }
 0x1fd   : > { %v2154_v37 = vpop.f32.mrf.mxu1  ;;  %v2160_v40 = vpop.f32.mrf.mxu0 }
 0x1fe   : > { %2775 = vst [vmem:[#allocation26_spill] sm:$0xff] %v2154_v37 }
 0x1ff   : > { %v551_v44 = vpop.trf.xlu1  ;;  %2777 = vst [vmem:[#allocation28_spill] sm:$0xff] %v2160_v40 }
 0x200   : > { %1470 = vmatmul.msk.f32.gmra.mxu2 %vm562_vm2, %v551_v44  ;;  %1503 = vmatmul.msk.f32.gmra.mxu3 %vm562_vm2, %v551_v44 }
 0x205   : > { %v2162_v41 = vpop.f32.mrf.mxu1  ;;  %v2168_v44 = vpop.f32.mrf.mxu0 }
 0x207   : > { %v552_v45 = vpop.trf.xlu1 }
 0x208   : > { %1471 = vmatmul.msk.f32.gmra.mxu2 %vm562_vm2, %v552_v45  ;;  %1504 = vmatmul.msk.f32.gmra.mxu3 %vm562_vm2, %v552_v45 }
 0x20f   : > { %v553_v46 = vpop.trf.xlu1 }
 0x210   : > { %1472 = vmatmul.msk.f32.gmra.mxu2 %vm562_vm2, %v553_v46  ;;  %1505 = vmatmul.msk.f32.gmra.mxu3 %vm562_vm2, %v553_v46  ;;  %v2172_v46 = vpop.f32.mrf.mxu1 }
 0x211   : > { %2779 = vst [vmem:[#allocation30_spill] sm:$0xff] %v2172_v46 }
 0x217   : > { %v554_v47 = vpop.trf.xlu1 }
 0x218   : > { %1473 = vmatmul.msk.f32.gmra.mxu2 %vm562_vm2, %v554_v47  ;;  %1506 = vmatmul.msk.f32.gmra.mxu3 %vm562_vm2, %v554_v47  ;;  %v2188_v5 = vpop.f32.mrf.mxu1 }
 0x21b   : > { %v2048_v48 = vpop.f32.mrf.mxu2 }
 0x21f   : > { %v555_v49 = vpop.trf.xlu1 }
 0x220   : > { %1474 = vmatmul.msk.f32.gmra.mxu2 %vm562_vm2, %v555_v49  ;;  %1507 = vmatmul.msk.f32.gmra.mxu3 %vm562_vm2, %v555_v49  ;;  %v892_v49 = vmax.f32 %v2112_v16, %v2132_v26 }
 0x223   : > { %v2052_v50 = vpop.f32.mrf.mxu2 }
 0x227   : > { %v556_v51 = vpop.trf.xlu1 }
 0x228   : > { %1475 = vmatmul.msk.f32.gmra.mxu2 %vm562_vm2, %v556_v51  ;;  %1508 = vmatmul.msk.f32.gmra.mxu3 %vm562_vm2, %v556_v51  ;;  %v893_v51 = vmax.f32 %v2124_v22, %v2140_v30 }
 0x22b   : > { %v2056_v52 = vpop.f32.mrf.mxu2  ;;  %v2058_v53 = vpop.f32.mrf.mxu3 }
 0x22f   : > { %v557_v54 = vpop.trf.xlu1 }
 0x230   : > { %1476 = vmatmul.msk.f32.gmra.mxu2 %vm562_vm2, %v557_v54  ;;  %1509 = vmatmul.msk.f32.gmra.mxu3 %vm562_vm2, %v557_v54  ;;  %v2180_v54 = vpop.f32.mrf.mxu0 }
 0x233   : > { %v2062_v55 = vpop.f32.mrf.mxu2  ;;  %v2064_v56 = vpop.f32.mrf.mxu3 }
 0x234   : > { %2759 = vst [vmem:[#allocation10_spill] sm:$0xff] %v2064_v56 }
 0x237   : > { %v558_v57 = vpop.trf.xlu1 }
 0x238   : > { %1477 = vmatmul.msk.f32.gmra.mxu2 %vm562_vm2, %v558_v57  ;;  %1510 = vmatmul.msk.f32.gmra.mxu3 %vm562_vm2, %v558_v57  ;;  %v894_v57 = vmax.f32 %v892_v49, %v2148_v34 }
 0x23b   : > { %v2068_v58 = vpop.f32.mrf.mxu2  ;;  %v2070_v59 = vpop.f32.mrf.mxu3 }
 0x23c   : > { %2760 = vst [vmem:[#allocation11_spill] sm:$0xff] %v2068_v58 }
 0x23f   : > { %v559_v60 = vpop.trf.xlu1 }
 0x240   : > { %1478 = vmatmul.msk.f32.gmra.mxu2 %vm562_vm2, %v559_v60  ;;  %1511 = vmatmul.msk.f32.gmra.mxu3 %vm562_vm2, %v559_v60  ;;  %v895_v60 = vmax.f32 %v893_v51, %v2160_v40 }
 0x242   : > { %v897_v11 = vmax.f32 %v895_v60, %v2180_v54 }
 0x243   : > { %v2074_v61 = vpop.f32.mrf.mxu2  ;;  %v2076_v62 = vpop.f32.mrf.mxu3 }
 0x244   : > { %v899_v8 = vmax.f32 %v897_v11, %v2052_v50 }
 0x246   : > { %v901_v26 = vmax.f32 %v899_v8, %v2062_v55  ;;  %v929_v8 = vmax.f32 %v2110_v15, %v2126_v23 }
 0x247   : > { %v560_v63 = vpop.trf.xlu1 }
 0x248   : > { %1479 = vmatmul.msk.f32.gmra.mxu2 %vm562_vm2, %v560_v63  ;;  %1512 = vmatmul.msk.f32.gmra.mxu3 %vm562_vm2, %v560_v63  ;;  %v903_v51 = vmax.f32 %v901_v26, %v2074_v61 }
 0x24b   : > { %v2080_v0 = vpop.f32.mrf.mxu2  ;;  %v2082_v1 = vpop.f32.mrf.mxu3 }
 0x24c   : > { %2761 = vst [vmem:[#allocation12_spill] sm:$0xff] %v2082_v1 }
 0x24f   : > { %v561_v2 = vpop.trf.xlu1 }
 0x250   : > { %1480 = vmatmul.msk.f32.gmra.mxu2 %vm562_vm2, %v561_v2  ;;  %1513 = vmatmul.msk.f32.gmra.mxu3 %vm562_vm2, %v561_v2  ;;  %v896_v2 = vmax.f32 %v894_v57, %v2168_v44 }
 0x252   : > { %v898_v12 = vmax.f32 %v896_v2, %v2048_v48  ;;  %v930_v2 = vmax.f32 %v2118_v19, %v2138_v29 }
 0x253   : > { %v2086_v3 = vpop.f32.mrf.mxu2  ;;  %v2088_v4 = vpop.f32.mrf.mxu3 }
 0x254   : > { %2762 = vst [vmem:[#allocation13_spill] sm:$0xff] %v2086_v3  ;;  %v900_v30 = vmax.f32 %v898_v12, %v2056_v52  ;;  %v905_v60 = vmax.f32 %v903_v51, %v2086_v3  ;;  %v931_v51 = vmax.f32 %v929_v8, %v2146_v33 }
 0x255   : > { %2763 = vst [vmem:[#allocation14_spill] sm:$0xff] %v2088_v4 }
 0x256   : > { %v902_v49 = vmax.f32 %v900_v30, %v2068_v58  ;;  %v932_v30 = vmax.f32 %v930_v2, %v2154_v37  ;;  %v2209_v58 = vpop.f32.mrf.mxu1  ;;  %v933_v23 = vmax.f32 %v931_v51, %v2162_v41 }
 0x257   : > { %2782 = vst [vmem:[#allocation33_spill] sm:$0xff] %v2209_v58 }
 0x258   : > { %v904_v57 = vmax.f32 %v902_v49, %v2080_v0  ;;  %v934_v3 = vmax.f32 %v932_v30, %v2172_v46  ;;  %v935_v8 = vmax.f32 %v933_v23, %v2188_v5 }
 0x25a   : > { %v936_v2 = vmax.f32 %v934_v3, %v2209_v58  ;;  %v937_v46 = vmax.f32 %v935_v8, %v2058_v53 }
 0x25b   : > { %v2092_v6 = vpop.f32.mrf.mxu2  ;;  %v2094_v7 = vpop.f32.mrf.mxu3 }
 0x25c   : > { %v906_v11 = vmax.f32 %v904_v57, %v2092_v6  ;;  %v938_v30 = vmax.f32 %v936_v2, %v2064_v56 }
 0x25e   : > { %v940_v51 = vmax.f32 %v938_v30, %v2076_v62 }
 0x263   : > { %v2098_v9 = vpop.f32.mrf.mxu2  ;;  %v2100_v10 = vpop.f32.mrf.mxu3 }
 0x264   : > { %2766 = vst [vmem:[#allocation17_spill] sm:$0xff] %v2100_v10  ;;  %v907_v12 = vmax.f32 %v905_v60, %v2098_v9 }
 0x26b   : > { %v2106_v13 = vpop.f32.mrf.mxu2  ;;  %v2108_v14 = vpop.f32.mrf.mxu3 }
 0x26c   : > { %v908_v26 = vmax.f32 %v906_v11, %v2106_v13 }
 0x273   : > { %v2114_v17 = vpop.f32.mrf.mxu2  ;;  %v2116_v18 = vpop.f32.mrf.mxu3 }
 0x274   : > { %v909_v49 = vmax.f32 %v907_v12, %v2114_v17 }
 0x27b   : > { %v2120_v20 = vpop.f32.mrf.mxu2  ;;  %v2122_v21 = vpop.f32.mrf.mxu3 }
 0x27c   : > { %v910_v29 = vmax.f32 %v908_v26, %v2120_v20 }
 0x283   : > { %v2128_v24 = vpop.f32.mrf.mxu2  ;;  %v2130_v25 = vpop.f32.mrf.mxu3 }
 0x284   : > { %v911_v57 = vmax.f32 %v909_v49, %v2128_v24 }
 0x28b   : > { %v2134_v27 = vpop.f32.mrf.mxu2  ;;  %v2136_v28 = vpop.f32.mrf.mxu3 }
 0x28c   : > { %v912_v11 = vmax.f32 %v910_v29, %v2134_v27  ;;  %v939_v29 = vmax.f32 %v937_v46, %v2070_v59 }
 0x293   : > { %v2142_v31 = vpop.f32.mrf.mxu2  ;;  %v2144_v32 = vpop.f32.mrf.mxu3 }
 0x294   : > { %v913_v12 = vmax.f32 %v911_v57, %v2142_v31  ;;  %v942_v57 = vmax.f32 %v940_v51, %v2088_v4 }
 0x29b   : > { %v2150_v35 = vpop.f32.mrf.mxu2  ;;  %v2152_v36 = vpop.f32.mrf.mxu3 }
 0x29c   : > { %2774 = vst [vmem:[#allocation25_spill] sm:$0xff] %v2152_v36  ;;  %v914_v26 = vmax.f32 %v912_v11, %v2150_v35  ;;  %v941_v11 = vmax.f32 %v939_v29, %v2082_v1 }
 0x29e   : > { %v943_v46 = vmax.f32 %v941_v11, %v2094_v7 }
 0x2a3   : > { %v2156_v38 = vpop.f32.mrf.mxu2  ;;  %v2158_v39 = vpop.f32.mrf.mxu3 }
 0x2a4   : > { %2776 = vst [vmem:[#allocation27_spill] sm:$0xff] %v2158_v39  ;;  %v915_v49 = vmax.f32 %v913_v12, %v2156_v38  ;;  %v944_v12 = vmax.f32 %v942_v57, %v2100_v10 }
 0x2ab   : > { %v2164_v42 = vpop.f32.mrf.mxu2  ;;  %v2166_v43 = vpop.f32.mrf.mxu3 }
 0x2ac   : > { %2778 = vst [vmem:[#allocation29_spill] sm:$0xff] %v2166_v43  ;;  %v916_v3 = vmax.f32 %v914_v26, %v2164_v42 }
 0x2b3   : > { %v2170_v45 = vpop.f32.mrf.mxu2  ;;  %v2174_v47 = vpop.f32.mrf.mxu3 }
 0x2b4   : > { %2780 = vst [vmem:[#allocation31_spill] sm:$0xff] %v2174_v47  ;;  %v917_v58 = vmax.f32 %v915_v49, %v2170_v45  ;;  %v946_v49 = vmax.f32 %v944_v12, %v2116_v18 }
 0x2bb   : > { %v2184_v63 = vpop.f32.mrf.mxu2  ;;  %v2194_v22 = vpop.f32.mrf.mxu3 }
 0x2bc   : > { %2781 = vst [vmem:[#allocation32_spill] sm:$0xff] %v2194_v22  ;;  %v918_v23 = vmax.f32 %v916_v3, %v2184_v63  ;;  %v945_v3 = vmax.f32 %v943_v46, %v2108_v14 }
 0x2be   : > { %v947_v57 = vmax.f32 %v945_v3, %v2122_v21 }
 0x2c3   : > { %v2198_v40 = vpop.f32.mrf.mxu2  ;;  %v2217_v60 = vpop.f32.mrf.mxu3 }
 0x2c4   : > { %2783 = vst [vmem:[#allocation34_spill] sm:$0xff] %v2217_v60  ;;  %v919_v2 = vmax.f32 %v917_v58, %v2198_v40  ;;  %v948_v58 = vmax.f32 %v946_v49, %v2130_v25 }
 0x2c6   : > { %v950_v10 = vmax.f32 %v948_v58, %v2144_v32 }
 0x2c8   : > { %v952_v1 = vmax.f32 %v950_v10, %v2158_v39 }
 0x2ca   : > { %v954_v12 = vmax.f32 %v952_v1, %v2174_v47 }
 0x2cb   : > { %v2221_v37 = vpop.f32.mrf.mxu2  ;;  %v2242_v30 = vpop.f32.mrf.mxu3 }
 0x2cc   : > { %v920_v8 = vmax.f32 %v918_v23, %v2221_v37  ;;  %v949_v23 = vmax.f32 %v947_v57, %v2136_v28  ;;  %v956_v49 = vmax.f32 %v954_v12, %v2217_v60  ;;  %v2786_v12 = vld [vmem:[#allocation24_spill] sm:$0xff] }
 0x2ce   : > { %v951_v11 = vmax.f32 %v949_v23, %v2152_v36 }
 0x2d0   : > { %v953_v46 = vmax.f32 %v951_v11, %v2166_v43 }
 0x2d2   : > { %v955_v58 = vmax.f32 %v953_v46, %v2194_v22 }
 0x2d3   : > { %v2239_v56 = vpop.f32.mrf.mxu2 }
 0x2d4   : > { %v921_v26 = vmax.f32 %v919_v2, %v2239_v56 }
 0x2d6   : > { %v922_v51 = vmax.f32 %v920_v8, %v921_v26  ;;  %v2255_v26 = vpop.f32.mrf.mxu3 }
 0x2d8   : > { %v923_v29 = vrot.slane %v922_v51, 4 }
 0x2da   : > { %v924_v4 = vmax.f32 %v922_v51, %v923_v29  ;;  %v958_v51 = vmax.f32 %v956_v49, %v2255_v26  ;;  %v957_v29 = vmax.f32 %v955_v58, %v2242_v30 }
 0x2dc   : > { %v925_v2 = vrot.slane %v924_v4, 2  ;;  %v959_v57 = vmax.f32 %v957_v29, %v958_v51 }
 0x2de   : > { %v926_v8 = vmax.f32 %v924_v4, %v925_v2  ;;  %v2784_v4 = vld [vmem:[#allocation20_spill] sm:$0xff]  ;;  %v2785_v2 = vld [vmem:[#allocation22_spill] sm:$0xff]  ;;  %v960_v46 = vrot.slane %v959_v57, 4 }
 0x2e0   : > { %v927_v3 = vrot.slane %v926_v8, 1  ;;  %v961_v22 = vmax.f32 %v959_v57, %v960_v46 }
 0x2e2   : > { %v2262_v10 = vmax.f32 %v926_v8, %v927_v3  ;;  %v2787_v8 = vld [vmem:[#allocation28_spill] sm:$0xff]  ;;  %v962_v57 = vrot.slane %v961_v22, 2 }
 0x2e4   : > { %v966_v1 = vsub.f32 %v2112_v16, %v2262_v10  ;;  %v968_v23 = vsub.f32 %v2784_v4, %v2262_v10  ;;  %v970_v11 = vsub.f32 %v2785_v2, %v2262_v10  ;;  %v972_v60 = vsub.f32 %v2786_v12, %v2262_v10 }
 0x2e5   : > { %v974_v49 = vsub.f32 %v2148_v34, %v2262_v10  ;;  %v976_v3 = vsub.f32 %v2787_v8, %v2262_v10  ;;  %v978_v58 = vsub.f32 %v2168_v44, %v2262_v10  ;;  %v980_v4 = vsub.f32 %v2180_v54, %v2262_v10 }
 0x2e6   : > { %v1030_v16 = vmul.f32 1.442695, %v966_v1  ;;  %v1034_v51 = vmul.f32 1.442695, %v968_v23  ;;  %v1038_v29 = vmul.f32 1.442695, %v970_v11  ;;  %v982_v12 = vsub.f32 %v2048_v48, %v2262_v10 }
 0x2e7   : > { %v1042_v2 = vmul.f32 1.442695, %v972_v60  ;;  %v1046_v47 = vmul.f32 1.442695, %v974_v49  ;;  %v984_v34 = vsub.f32 %v2052_v50, %v2262_v10  ;;  %v1050_v8 = vmul.f32 1.442695, %v976_v3 }
 0x2e8   : > { %1577 = vpow2.f32 %v1030_v16  ;;  %v986_v44 = vsub.f32 %v2056_v52, %v2262_v10  ;;  %v1054_v1 = vmul.f32 1.442695, %v978_v58  ;;  %v988_v54 = vsub.f32 %v2062_v55, %v2262_v10  ;;  %v2788_v48 = vld [vmem:[#allocation11_spill] sm:$0xff]  ;;  %v2789_v58 = vld [vmem:[#allocation13_spill] sm:$0xff] }
 0x2e9   : > { %1579 = vpow2.f32 %v1034_v51  ;;  %v1058_v60 = vmul.f32 1.442695, %v980_v4  ;;  %v990_v23 = vsub.f32 %v2788_v48, %v2262_v10  ;;  %v1062_v11 = vmul.f32 1.442695, %v982_v12 }
 0x2ea   : > { %1581 = vpow2.f32 %v1038_v29  ;;  %v992_v50 = vsub.f32 %v2074_v61, %v2262_v10  ;;  %v1066_v46 = vmul.f32 1.442695, %v984_v34  ;;  %v994_v52 = vsub.f32 %v2080_v0, %v2262_v10 }
 0x2eb   : > { %1583 = vpow2.f32 %v1042_v2  ;;  %v1070_v55 = vmul.f32 1.442695, %v986_v44  ;;  %v996_v16 = vsub.f32 %v2789_v58, %v2262_v10  ;;  %v963_v51 = vmax.f32 %v961_v22, %v962_v57 }
 0x2ec   : > { %1585 = vpow2.f32 %v1046_v47  ;;  %v1074_v47 = vmul.f32 1.442695, %v988_v54  ;;  %v998_v61 = vsub.f32 %v2092_v6, %v2262_v10  ;;  %v1078_v4 = vmul.f32 1.442695, %v990_v23 }
 0x2ed   : > { %1587 = vpow2.f32 %v1050_v8  ;;  %v1000_v12 = vsub.f32 %v2098_v9, %v2262_v10  ;;  %v1002_v34 = vsub.f32 %v2106_v13, %v2262_v10  ;;  %v1082_v22 = vmul.f32 1.442695, %v992_v50 }
 0x2ee   : > { %v2292_v49 = vpop.eup %1577  ;;  %1589 = vpow2.f32 %v1054_v1  ;;  %v1004_v6 = vsub.f32 %v2114_v17, %v2262_v10  ;;  %v1086_v44 = vmul.f32 1.442695, %v994_v52  ;;  %v1008_v9 = vsub.f32 %v2128_v24, %v2262_v10 }
 0x2ef   : > { %v2296_v3 = vpop.eup %1579  ;;  %1591 = vpow2.f32 %v1058_v60  ;;  %v1006_v60 = vsub.f32 %v2120_v20, %v2262_v10  ;;  %v1090_v13 = vmul.f32 1.442695, %v996_v16  ;;  %v1010_v48 = vsub.f32 %v2134_v27, %v2262_v10 }
 0x2f0   : > { %v2300_v29 = vpop.eup %1581  ;;  %1593 = vpow2.f32 %v1062_v11  ;;  %v1158_v0 = vadd.f32 %v2296_v3, %v2292_v49  ;;  %v1094_v17 = vmul.f32 1.442695, %v998_v61  ;;  %v1012_v50 = vsub.f32 %v2142_v31, %v2262_v10 }
 0x2f1   : > { %v2306_v2 = vpop.eup %1583  ;;  %1595 = vpow2.f32 %v1066_v46  ;;  %v1014_v20 = vsub.f32 %v2150_v35, %v2262_v10  ;;  %v1098_v24 = vmul.f32 1.442695, %v1000_v12  ;;  %v1016_v52 = vsub.f32 %v2156_v38, %v2262_v10 }
 0x2f2   : > { %v2312_v8 = vpop.eup %1585  ;;  %1597 = vpow2.f32 %v1070_v55  ;;  %v1159_v1 = vadd.f32 %v2300_v29, %v1158_v0  ;;  %v1102_v27 = vmul.f32 1.442695, %v1002_v34  ;;  %v1018_v16 = vsub.f32 %v2164_v42, %v2262_v10 }
 0x2f3   : > { %v2317_v54 = vpop.eup %1587  ;;  %1599 = vpow2.f32 %v1074_v47  ;;  %v1106_v31 = vmul.f32 1.442695, %v1004_v6  ;;  %v964_v47 = vrot.slane %v963_v51, 1  ;;  %v1020_v61 = vsub.f32 %v2170_v45, %v2262_v10 }
 0x2f4   : > { %v2323_v57 = vpop.eup %1589  ;;  %1601 = vpow2.f32 %v1078_v4  ;;  %v1160_v23 = vadd.f32 %v2306_v2, %v1159_v1  ;;  %v1110_v4 = vmul.f32 1.442695, %v1006_v60  ;;  %v1022_v12 = vsub.f32 %v2184_v63, %v2262_v10 }
 0x2f5   : > { %2790 = vst [vmem:[#allocation20_spill] sm:$0xff] %v2323_v57  ;;  %v2328_v11 = vpop.eup %1591  ;;  %1603 = vpow2.f32 %v1082_v22  ;;  %v1024_v42 = vsub.f32 %v2198_v40, %v2262_v10  ;;  %v1114_v34 = vmul.f32 1.442695, %v1008_v9  ;;  %v1026_v6 = vsub.f32 %v2221_v37, %v2262_v10 }
 0x2f6   : > { %2791 = vst [vmem:[#allocation22_spill] sm:$0xff] %v2328_v11  ;;  %v2334_v46 = vpop.eup %1593  ;;  %1605 = vpow2.f32 %v1086_v44  ;;  %v1161_v55 = vadd.f32 %v2312_v8, %v1160_v23  ;;  %v1118_v45 = vmul.f32 1.442695, %v1010_v48  ;;  %v1028_v60 = vsub.f32 %v2239_v56, %v2262_v10 }
 0x2f7   : > { %v2339_v58 = vpop.eup %1595  ;;  %1607 = vpow2.f32 %v1090_v13  ;;  %v1122_v63 = vmul.f32 1.442695, %v1012_v50  ;;  %v2363_v13 = vmax.f32 %v963_v51, %v964_v47  ;;  %v1126_v9 = vmul.f32 1.442695, %v1014_v20 }
 0x2f8   : > { %2792 = vst [vmem:[#allocation24_spill] sm:$0xff] %v2339_v58  ;;  %v2343_v35 = vpop.eup %1597  ;;  %1609 = vpow2.f32 %v1094_v17  ;;  %v1162_v38 = vadd.f32 %v2317_v54, %v1161_v55  ;;  %v1130_v17 = vmul.f32 1.442695, %v1016_v52  ;;  %v1134_v48 = vmul.f32 1.442695, %v1018_v16 }
 0x2f9   : > { %v2348_v0 = vpop.eup %1599  ;;  %1611 = vpow2.f32 %v1098_v24  ;;  %v1138_v24 = vmul.f32 1.442695, %v1020_v61  ;;  %v1146_v56 = vmul.f32 1.442695, %v1024_v42  ;;  %v1150_v10 = vmul.f32 1.442695, %v1026_v6 }
 0x2fa   : > { %v2354_v22 = vpop.eup %1601  ;;  %1613 = vpow2.f32 %v1102_v27  ;;  %v1163_v44 = vadd.f32 %v2323_v57, %v1162_v38  ;;  %v1142_v27 = vmul.f32 1.442695, %v1022_v12  ;;  %v1154_v20 = vmul.f32 1.442695, %v1028_v60  ;;  %v2793_v61 = vld [vmem:[#allocation21_spill] sm:$0xff]  ;;  %v2794_v38 = vld [vmem:[#allocation23_spill] sm:$0xff] }
 0x2fb   : > { %v2359_v1 = vpop.eup %1603  ;;  %1615 = vpow2.f32 %v1106_v31  ;;  %v967_v52 = vsub.f32 %v2110_v15, %v2363_v13  ;;  %v969_v31 = vsub.f32 %v2118_v19, %v2363_v13  ;;  %v973_v12 = vsub.f32 %v2794_v38, %v2363_v13  ;;  %v2796_v60 = vld [vmem:[#allocation30_spill] sm:$0xff] }
 0x2fc   : > { %v2365_v40 = vpop.eup %1605  ;;  %1617 = vpow2.f32 %v1110_v4  ;;  %v1164_v37 = vadd.f32 %v2328_v11, %v1163_v44  ;;  %v971_v4 = vsub.f32 %v2793_v61, %v2363_v13  ;;  %v975_v15 = vsub.f32 %v2146_v33, %v2363_v13  ;;  %v2797_v33 = vld [vmem:[#allocation33_spill] sm:$0xff] }
 0x2fd   : > { %v2368_v23 = vpop.eup %1607  ;;  %1619 = vpow2.f32 %v1114_v34  ;;  %v2795_v34 = vld [vmem:[#allocation26_spill] sm:$0xff]  ;;  %v979_v6 = vsub.f32 %v2162_v41, %v2363_v13  ;;  %v987_v41 = vsub.f32 %v2058_v53, %v2363_v13  ;;  %v1032_v38 = vmul.f32 1.442695, %v967_v52  ;;  %v2799_v53 = vld [vmem:[#allocation12_spill] sm:$0xff] }
 0x2fe   : > { %v2370_v55 = vpop.eup %1609  ;;  %1621 = vpow2.f32 %v1118_v45  ;;  %v1165_v51 = vadd.f32 %v2334_v46, %v1164_v37  ;;  %v977_v19 = vsub.f32 %v2795_v34, %v2363_v13  ;;  %v985_v37 = vsub.f32 %v2797_v33, %v2363_v13 }
 0x2ff   : > { %v2373_v50 = vpop.eup %1611  ;;  %1623 = vpow2.f32 %v1122_v63  ;;  %v981_v63 = vsub.f32 %v2796_v60, %v2363_v13  ;;  %v995_v60 = vsub.f32 %v2799_v53, %v2363_v13  ;;  %v1036_v33 = vmul.f32 1.442695, %v969_v31 }
 0x300   : > { %v2379_v16 = vpop.eup %1613  ;;  %1625 = vpow2.f32 %v1126_v9  ;;  %v1166_v47 = vadd.f32 %v2339_v58, %v1165_v51  ;;  %v983_v9 = vsub.f32 %v2188_v5, %v2363_v13  ;;  %v2798_v51 = vld [vmem:[#allocation10_spill] sm:$0xff]  ;;  %v991_v5 = vsub.f32 %v2070_v59, %v2363_v13 }
 0x301   : > { %v2386_v42 = vpop.eup %1615  ;;  %1627 = vpow2.f32 %v1130_v17  ;;  %v1040_v59 = vmul.f32 1.442695, %v971_v4  ;;  %v1044_v53 = vmul.f32 1.442695, %v973_v12  ;;  %v1068_v11 = vmul.f32 1.442695, %v985_v37 }
 0x302   : > { %v2394_v45 = vpop.eup %1617  ;;  %1629 = vpow2.f32 %v1134_v48  ;;  %v1167_v44 = vadd.f32 %v2343_v35, %v1166_v47  ;;  %v989_v48 = vsub.f32 %v2798_v51, %v2363_v13  ;;  %v1080_v57 = vmul.f32 1.442695, %v991_v5 }
 0x303   : > { %v2401_v17 = vpop.eup %1619  ;;  %1631 = vpow2.f32 %v1138_v24  ;;  %v993_v24 = vsub.f32 %v2076_v62, %v2363_v13  ;;  %v2801_v62 = vld [vmem:[#allocation17_spill] sm:$0xff] }
 0x304   : > { %v2409_v61 = vpop.eup %1621  ;;  %1633 = vpow2.f32 %v1142_v27  ;;  %v1168_v47 = vadd.f32 %v2348_v0, %v1167_v44  ;;  %v2800_v44 = vld [vmem:[#allocation14_spill] sm:$0xff]  ;;  %v1001_v39 = vsub.f32 %v2801_v62, %v2363_v13  ;;  %v1052_v62 = vmul.f32 1.442695, %v977_v19 }
 0x305   : > { %v2414_v34 = vpop.eup %1623  ;;  %1635 = vpow2.f32 %v1146_v56  ;;  %v997_v43 = vsub.f32 %v2800_v44, %v2363_v13  ;;  %v999_v56 = vsub.f32 %v2094_v7, %v2363_v13  ;;  %v1048_v44 = vmul.f32 1.442695, %v975_v15 }
 0x306   : > { %v2420_v51 = vpop.eup %1625  ;;  %1637 = vpow2.f32 %v1150_v10  ;;  %v1169_v27 = vadd.f32 %v2354_v22, %v1168_v47  ;;  %v1003_v47 = vsub.f32 %v2108_v14, %v2363_v13  ;;  %v1056_v14 = vmul.f32 1.442695, %v979_v6 }
 0x307   : > { %v2425_v52 = vpop.eup %1627  ;;  %1639 = vpow2.f32 %v1154_v20  ;;  %v1005_v20 = vsub.f32 %v2116_v18, %v2363_v13  ;;  %v1072_v6 = vmul.f32 1.442695, %v987_v41  ;;  %v1096_v37 = vmul.f32 1.442695, %v999_v56 }
 0x308   : > { %v2431_v31 = vpop.eup %1629  ;;  %v1170_v10 = vadd.f32 %v2359_v1, %v1169_v27  ;;  %1641 = vpow2.f32 %v1032_v38 }
 0x309   : > { %v2436_v4 = vpop.eup %1631  ;;  %1643 = vpow2.f32 %v1036_v33  ;;  %v1060_v33 = vmul.f32 1.442695, %v981_v63  ;;  %v1254_v63 = vpack.c.bf16 %v2368_v23, %v2365_v40 }
 0x30a   : > { %v2442_v12 = vpop.eup %1633  ;;  %v1171_v36 = vadd.f32 %v2365_v40, %v1170_v10  ;;  %1645 = vpow2.f32 %v1040_v59  ;;  %v1064_v10 = vmul.f32 1.442695, %v983_v9  ;;  %v1076_v59 = vmul.f32 1.442695, %v989_v48 }
 0x30b   : > { %v2447_v15 = vpop.eup %1635  ;;  %1647 = vpow2.f32 %v1044_v53  ;;  %v1084_v53 = vmul.f32 1.442695, %v993_v24  ;;  %v1092_v9 = vmul.f32 1.442695, %v997_v43  ;;  %v1100_v48 = vmul.f32 1.442695, %v1001_v39  ;;  %1272 = vmatpush.bf16.xpose.msra.mxu0 %v1254_v63 }
 0x30c   : > { %v2453_v19 = vpop.eup %1637  ;;  %v1172_v7 = vadd.f32 %v2368_v23, %v1171_v36  ;;  %1649 = vpow2.f32 %v1048_v44  ;;  %v1088_v36 = vmul.f32 1.442695, %v995_v60  ;;  %v1244_v40 = vpack.c.bf16 %v2317_v54, %v2312_v8 }
 0x30d   : > { %v2456_v27 = vpop.eup %1639  ;;  %1651 = vpow2.f32 %v1052_v62 }
 0x30e   : > { %v2458_v58 = vpop.eup %1641  ;;  %v1173_v38 = vadd.f32 %v2370_v55, %v1172_v7  ;;  %1653 = vpow2.f32 %v1056_v14 }
 0x30f   : > { %v2463_v18 = vpop.eup %1643  ;;  %1655 = vpow2.f32 %v1060_v33 }
 0x310   : > { %v2465_v44 = vpop.eup %1645  ;;  %v1174_v41 = vadd.f32 %v2373_v50, %v1173_v38  ;;  %1657 = vpow2.f32 %v1064_v10  ;;  %v1195_v5 = vadd.f32 %v2463_v18, %v2458_v58 }
 0x311   : > { %v2470_v24 = vpop.eup %1647  ;;  %1659 = vpow2.f32 %v1068_v11 }
 0x312   : > { %v2478_v60 = vpop.eup %1649  ;;  %v1175_v39 = vadd.f32 %v2379_v16, %v1174_v41  ;;  %1661 = vpow2.f32 %v1072_v6  ;;  %v1196_v56 = vadd.f32 %v2465_v44, %v1195_v5  ;;  %v1104_v6 = vmul.f32 1.442695, %v1003_v47 }
 0x313   : > { %v2484_v11 = vpop.eup %1651  ;;  %1663 = vpow2.f32 %v1076_v59  ;;  %v1108_v59 = vmul.f32 1.442695, %v1005_v20  ;;  %v1252_v47 = vpack.c.bf16 %v2359_v1, %v2354_v22  ;;  %v2802_v22 = vsub.f32 %v2122_v21, %v2363_v13 }
 0x314   : > { %v2492_v33 = vpop.eup %1653  ;;  %v1176_v10 = vadd.f32 %v2386_v42, %v1175_v39  ;;  %1665 = vpow2.f32 %v1080_v57  ;;  %v1197_v63 = vadd.f32 %v2470_v24, %v1196_v56 }
 0x315   : > { %v2496_v41 = vpop.eup %1655  ;;  %1667 = vpow2.f32 %v1084_v53  ;;  %v1112_v1 = vmul.f32 1.442695, %v2802_v22  ;;  %1273 = vmatpush.bf16.xpose.msra.mxu0 %v1252_v47 }
 0x316   : > { %v2502_v7 = vpop.eup %1657  ;;  %v1177_v38 = vadd.f32 %v2394_v45, %v1176_v10  ;;  %1669 = vpow2.f32 %v1088_v36  ;;  %v1198_v57 = vadd.f32 %v2478_v60, %v1197_v63  ;;  %v2803_v63 = vsub.f32 %v2130_v25, %v2363_v13 }
 0x317   : > { %v2508_v39 = vpop.eup %1659  ;;  %1671 = vpow2.f32 %v1092_v9  ;;  %v1247_v8 = vpack.c.bf16 %v2496_v41, %v2492_v33 }
 0x318   : > { %v2516_v62 = vpop.eup %1661  ;;  %v1178_v36 = vadd.f32 %v2401_v17, %v1177_v38  ;;  %1673 = vpow2.f32 %v1096_v37  ;;  %v1199_v9 = vadd.f32 %v2484_v11, %v1198_v57  ;;  %v1116_v53 = vmul.f32 1.442695, %v2803_v63 }
 0x319   : > { %v2523_v10 = vpop.eup %1663  ;;  %1675 = vpow2.f32 %v1100_v48  ;;  %v2804_v37 = vsub.f32 %v2136_v28, %v2363_v13  ;;  %v2805_v57 = vsub.f32 %v2144_v32, %v2363_v13  ;;  %v1250_v28 = vpack.c.bf16 %v2348_v0, %v2343_v35 }
 0x31a   : > { %v1666_v56 = vpop.eup %1665  ;;  %v1179_v20 = vadd.f32 %v2409_v61, %v1178_v36  ;;  %1677 = vpow2.f32 %v1104_v6  ;;  %v1200_v21 = vadd.f32 %v2492_v33, %v1199_v9  ;;  %v1027_v6 = vsub.f32 %v2242_v30, %v2363_v13 }
 0x31b   : > { %v1120_v38 = vmul.f32 1.442695, %v2804_v37  ;;  %v1668_v22 = vpop.eup %1667  ;;  %1679 = vpow2.f32 %v1108_v59  ;;  %v1124_v48 = vmul.f32 1.442695, %v2805_v57  ;;  %v1245_v33 = vpack.c.bf16 %v2484_v11, %v2478_v60  ;;  %v2818_v60 = vld [vmem:[#allocation16_spill] sm:$0xff] }
 0x31c   : > { %v1670_v47 = vpop.eup %1669  ;;  %v1180_v25 = vadd.f32 %v2414_v34, %v1179_v20  ;;  %1681 = vpow2.f32 %v1112_v1  ;;  %v1201_v63 = vadd.f32 %v2496_v41, %v1200_v21  ;;  %v1029_v1 = vsub.f32 %v2255_v26, %v2363_v13 }
 0x31d   : > { %v1672_v36 = vpop.eup %1671  ;;  %1683 = vpow2.f32 %v1116_v53  ;;  %1274 = vmatpush.bf16.xpose.msra.mxu0 %v1250_v28 }
 0x31e   : > { %v2542_v9 = vpop.eup %1673  ;;  %v1181_v59 = vadd.f32 %v2420_v51, %v1180_v25  ;;  %1685 = vpow2.f32 %v1120_v38  ;;  %v1202_v32 = vadd.f32 %v2502_v7, %v1201_v63  ;;  %v1255_v37 = vpack.c.bf16 %v1672_v36, %v1670_v47 }
 0x31f   : > { %v2546_v20 = vpop.eup %1675  ;;  %1687 = vpow2.f32 %v1124_v48  ;;  %v1152_v25 = vmul.f32 1.442695, %v1027_v6  ;;  %v1253_v6 = vpack.c.bf16 %v1668_v22, %v1666_v56 }
 0x320   : > { %v2550_v21 = vpop.eup %1677  ;;  %v1182_v30 = vadd.f32 %v2425_v52, %v1181_v59  ;;  %v1203_v35 = vadd.f32 %v2508_v39, %v1202_v32  ;;  %1286 = vmatpush.bf16.xpose.msrb.mxu1 %v1255_v37  ;;  %v1156_v59 = vmul.f32 1.442695, %v1029_v1 }
 0x321   : > { %v2556_v53 = vpop.eup %1679  ;;  %1689 = vpow2.f32 %v1152_v25  ;;  %v1251_v25 = vpack.c.bf16 %v2523_v10, %v2516_v62 }
 0x322   : > { %v2558_v38 = vpop.eup %1681  ;;  %v1183_v57 = vadd.f32 %v2431_v31, %v1182_v30  ;;  %v1204_v26 = vadd.f32 %v2516_v62, %v1203_v35  ;;  %v2806_v30 = vld [vmem:[#allocation24_spill] sm:$0xff]  ;;  %1691 = vpow2.f32 %v1156_v59  ;;  %v2811_v62 = vld [vmem:[#allocation29_spill] sm:$0xff] }
 0x323   : > { %v2564_v63 = vpop.eup %1683  ;;  %v1248_v35 = vpack.c.bf16 %v2806_v30, %v2334_v46  ;;  %v2807_v59 = vld [vmem:[#allocation20_spill] sm:$0xff] }
 0x324   : > { %v2566_v32 = vpop.eup %1685  ;;  %v1184_v28 = vadd.f32 %v2436_v4, %v1183_v57  ;;  %v1205_v37 = vadd.f32 %v2523_v10, %v1204_v26  ;;  %v1019_v10 = vsub.f32 %v2811_v62, %v2363_v13 }
 0x325   : > { %v2572_v5 = vpop.eup %1687  ;;  %1275 = vmatpush.bf16.xpose.msra.mxu0 %v1248_v35 }
 0x326   : > { %v1185_v48 = vadd.f32 %v2442_v12, %v1184_v28  ;;  %v1206_v14 = vadd.f32 %v1666_v56, %v1205_v37 }
 0x327   : > { %v2581_v43 = vpop.eup %1689 }
 0x328   : > { %v1186_v57 = vadd.f32 %v2447_v15, %v1185_v48  ;;  %v1207_v26 = vadd.f32 %v1668_v22, %v1206_v14  ;;  %1287 = vmatpush.bf16.xpose.msrb.mxu1 %v1253_v6  ;;  %v2584_v28 = vpop.eup %1691  ;;  %v2808_v48 = vld [vmem:[#allocation22_spill] sm:$0xff] }
 0x329   : > { %v1246_v14 = vpack.c.bf16 %v2808_v48, %v2807_v59  ;;  %v1271_v22 = vpack.c.bf16 %v2584_v28, %v2581_v43  ;;  %v2812_v59 = vld [vmem:[#allocation31_spill] sm:$0xff] }
 0x32a   : > { %v1187_v0 = vadd.f32 %v2453_v19, %v1186_v57  ;;  %v1208_v23 = vadd.f32 %v1670_v47, %v1207_v26  ;;  %v2809_v47 = vld [vmem:[#allocation25_spill] sm:$0xff]  ;;  %v1021_v48 = vsub.f32 %v2812_v59, %v2363_v13  ;;  %v2815_v59 = vpack.c.bf16 %v2306_v2, %v2300_v29 }
 0x32b   : > { %v1015_v37 = vsub.f32 %v2809_v47, %v2363_v13  ;;  %v2816_v29 = vpack.c.bf16 %v2296_v3, %v2292_v49  ;;  %v2817_v2 = vpack.c.bf16 %v2456_v27, %v2453_v19  ;;  %v2820_v49 = vpack.c.bf16 %v2470_v24, %v2465_v44  ;;  %v2825_v24 = vld [vmem:[#allocation18_spill] sm:$0xff] }
 0x32c   : > { %v1188_v46 = vadd.f32 %v2456_v27, %v1187_v0  ;;  %v1209_v30 = vadd.f32 %v1672_v36, %v1208_v23  ;;  %v2810_v23 = vld [vmem:[#allocation27_spill] sm:$0xff]  ;;  %v2821_v3 = vpack.c.bf16 %v2447_v15, %v2442_v12  ;;  %v2823_v12 = vpack.c.bf16 %v2436_v4, %v2431_v31 }
 0x32d   : > { %1276 = vmatpush.bf16.xpose.msra.mxu0 %v1246_v14  ;;  %v1017_v36 = vsub.f32 %v2810_v23, %v2363_v13  ;;  %v1128_v57 = vmul.f32 1.442695, %v1015_v37  ;;  %v2813_v14 = vld [vmem:[#allocation32_spill] sm:$0xff]  ;;  %v2824_v15 = vld [vmem:[#allocation15_spill] sm:$0xff]  ;;  %v2826_v31 = vpack.c.bf16 %v2414_v34, %v2409_v61  ;;  %v2830_v61 = vpack.c.bf16 %v2564_v63, %v2558_v38 }
 0x32e   : > { %v1210_v56 = vadd.f32 %v2542_v9, %v1209_v30  ;;  %v1189_v6 = vrot.slane %v1188_v46, 4  ;;  %v1023_v23 = vsub.f32 %v2813_v14, %v2363_v13  ;;  %v2831_v34 = vpack.c.bf16 %v2373_v50, %v2370_v55  ;;  %v1709_v55 = vld [vmem:[%s1956_s21] sm:$0xff] }
 0x32f   : > { %v1132_v47 = vmul.f32 1.442695, %v1017_v36  ;;  %1693 = vpow2.f32 %v1128_v57  ;;  %v1140_v36 = vmul.f32 1.442695, %v1021_v48 }
 0x330   : > { %v1211_v0 = vadd.f32 %v2546_v20, %v1210_v56  ;;  %1288 = vmatpush.bf16.xpose.msrb.mxu1 %v1251_v25  ;;  %v1190_v26 = vadd.f32 %v1189_v6, %v1188_v46  ;;  %v1249_v25 = vpack.c.bf16 %v2508_v39, %v2502_v7  ;;  %v2814_v46 = vld [vmem:[#allocation34_spill] sm:$0xff]  ;;  %v1144_v39 = vmul.f32 1.442695, %v1023_v23 }
 0x331   : > { %v1025_v6 = vsub.f32 %v2814_v46, %v2363_v13  ;;  %1695 = vpow2.f32 %v1132_v47  ;;  %v439_v47 = vpop.permute.xlu2 %438 }
 0x332   : > { %v1212_v35 = vadd.f32 %v2550_v21, %v1211_v0  ;;  %v1136_v0 = vmul.f32 1.442695, %v1019_v10  ;;  %v1191_v1 = vrot.slane %v1190_v26, 2  ;;  %v470_v11 = vadd.f32 %v2818_v60, %v439_v47 }
 0x333   : > { %v1148_v57 = vmul.f32 1.442695, %v1025_v6  ;;  %v493_v44 = vadd.f32 %v2824_v15, %v439_v47 }
 0x334   : > { %v1213_v30 = vadd.f32 %v2556_v53, %v1212_v35  ;;  %1697 = vpow2.f32 %v1136_v0  ;;  %v1192_v35 = vadd.f32 %v1191_v1, %v1190_v26 }
 0x335   : > { %1277 = vmatpush.bf16.xpose.msra.mxu0 %v1244_v40  ;;  %v2617_v10 = vpop.eup %1693  ;;  %1699 = vpow2.f32 %v1140_v36 }
 0x336   : > { %v1214_v56 = vadd.f32 %v2558_v38, %v1213_v30  ;;  %1701 = vpow2.f32 %v1144_v39  ;;  %v1193_v13 = vrot.slane %v1192_v35, 1  ;;  %v2819_v39 = vld [vmem:[#allocation19_spill] sm:$0xff] }
 0x337   : > { %v1696_v54 = vpop.eup %1695  ;;  %1703 = vpow2.f32 %v1148_v57 }
 0x338   : > { %v1215_v37 = vadd.f32 %v2564_v63, %v1214_v56  ;;  %1289 = vmatpush.bf16.xpose.msrb.mxu1 %v1249_v25  ;;  %v1194_v56 = vadd.f32 %v1193_v13, %v1192_v35  ;;  %v1265_v4 = vpack.c.bf16 %v1696_v54, %v2617_v10 }
 0x339   : > { %v444_v36 = vpop.permute.xlu2 %443 }
 0x33a   : > { %v1216_v7 = vadd.f32 %v2566_v32, %v1215_v37  ;;  %v1698_v1 = vpop.eup %1697  ;;  %1705 = vrcp.f32 %v1194_v56  ;;  %v473_v35 = vadd.f32 %v2819_v39, %v444_v36 }
 0x33b   : > { %v1700_v48 = vpop.eup %1699 }
 0x33c   : > { %v1217_v62 = vadd.f32 %v2572_v5, %v1216_v7  ;;  %v1702_v14 = vpop.eup %1701 }
 0x33d   : > { %1278 = vmatpush.bf16.xpose.msra.mxu0 %v2815_v59  ;;  %v1704_v41 = vpop.eup %1703  ;;  %v2822_v59 = vpack.c.bf16 %v2463_v18, %v2458_v58 }
 0x33e   : > { %v1218_v30 = vadd.f32 %v2617_v10, %v1217_v62  ;;  %v1269_v56 = vpack.c.bf16 %v1704_v41, %v1702_v14 }
 0x340   : > { %v1219_v40 = vadd.f32 %v1696_v54, %v1218_v30  ;;  %1290 = vmatpush.bf16.xpose.msrb.mxu1 %v1247_v8  ;;  %v1706_v6 = vpop.eup %1705 }
 0x341   : > { %v1234_v27 = vmul.f32 %v1706_v6, %v470_v11  ;;  %v1236_v19 = vmul.f32 %v1706_v6, %v473_v35 }
 0x342   : > { %v1220_v26 = vadd.f32 %v1698_v1, %v1219_v40 }
 0x343   : > { %v1238_v30 = vpack.c.bf16 %v1236_v19, %v1234_v27 }
 0x344   : > { %v1221_v25 = vadd.f32 %v1700_v48, %v1220_v26  ;;  %v496_v26 = vadd.f32 %v2825_v24, %v444_v36 }
 0x345   : > { %1279 = vmatpush.bf16.xpose.msra.mxu0 %v2816_v29 }
 0x346   : > { %v1222_v23 = vadd.f32 %v1702_v14, %v1221_v25  ;;  %v1264_v25 = vpack.c.bf16 %v2425_v52, %v2420_v51  ;;  %v2828_v51 = vpack.c.bf16 %v2572_v5, %v2566_v32  ;;  %v2829_v52 = vpack.c.bf16 %v2386_v42, %v2379_v16  ;;  %v1711_v14 = vld [vmem:[%s1956_s21 + $0x8] sm:$0xff] }
 0x347   : > { %v1329_v5 = vstv %s1328_s13 }
 0x348   : > { %v1223_v0 = vadd.f32 %v1704_v41, %v1222_v23  ;;  %1291 = vmatpush.bf16.xpose.msrb.mxu1 %v1245_v33 }
 0x34a   : > { %v1224_v37 = vadd.f32 %v2581_v43, %v1223_v0 }
 0x34c   : > { %v1225_v46 = vadd.f32 %v2584_v28, %v1224_v37  ;;  %1280 = vmatmul.bf16.vlgmr.msra.gmra.mxu0 %v1238_v30  ;;  %v1267_v28 = vpack.c.bf16 %v1700_v48, %v1698_v1  ;;  %v1712_v37 = vld [vmem:[%s1956_s21 + $0x18] sm:$0xff] }
 0x34d   : > { %1300 = vmatpush.bf16.xpose.msrb.mxu0 %v2817_v2 }
 0x34e   : > { %v1226_v7 = vrot.slane %v1225_v46, 4 }
 0x350   : > { %v1227_v62 = vadd.f32 %v1226_v7, %v1225_v46  ;;  %1292 = vmatpush.bf16.xpose.msrb.mxu1 %v2820_v49 }
 0x352   : > { %v1228_v57 = vrot.slane %v1227_v62, 2 }
 0x354   : > { %v1229_v8 = vadd.f32 %v1228_v57, %v1227_v62 }
 0x355   : > { %1301 = vmatpush.bf16.xpose.msrb.mxu0 %v2821_v3 }
 0x356   : > { %v1230_v13 = vrot.slane %v1229_v8, 1 }
 0x358   : > { %v1231_v40 = vadd.f32 %v1230_v13, %v1229_v8  ;;  %1293 = vmatpush.bf16.xpose.msrb.mxu1 %v2822_v59 }
 0x35a   : > { %1707 = vrcp.f32 %v1231_v40 }
 0x35d   : > { %1302 = vmatpush.bf16.xpose.msrb.mxu0 %v2823_v12 }
 0x360   : > { %1314 = vmatpush.bf16.xpose.msra.mxu1 %v1271_v22  ;;  %v1708_v23 = vpop.eup %1707  ;;  %v2827_v22 = vpack.c.bf16 %v2401_v17, %v2394_v45  ;;  %v2832_v45 = vpack.c.bf16 %v2556_v53, %v2550_v21  ;;  %v2833_v17 = vpack.c.bf16 %v2546_v20, %v2542_v9  ;;  %v1710_v20 = vld [vmem:[%s1956_s21 + $0x10] sm:$0xff] }
 0x361   : > { %v1235_v58 = vmul.f32 %v1708_v23, %v493_v44  ;;  %v1237_v18 = vmul.f32 %v1708_v23, %v496_v26 }
 0x363   : > { %v1239_v43 = vpack.c.bf16 %v1237_v18, %v1235_v58 }
 0x365   : > { %1303 = vmatpush.bf16.xpose.msrb.mxu0 %v1264_v25  ;;  %1294 = vmatmul.bf16.vlgmr.msrb.gmra.mxu1 %v1239_v43 }
 0x368   : > { %1315 = vmatpush.bf16.xpose.msra.mxu1 %v1269_v56 }
 0x36d   : > { %1304 = vmatpush.bf16.xpose.msrb.mxu0 %v2826_v31 }
 0x370   : > { %1316 = vmatpush.bf16.xpose.msra.mxu1 %v1267_v28 }
 0x375   : > { %1305 = vmatpush.bf16.xpose.msrb.mxu0 %v2827_v22 }
 0x378   : > { %1317 = vmatpush.bf16.xpose.msra.mxu1 %v1265_v4 }
 0x37d   : > { %1306 = vmatpush.bf16.xpose.msrb.mxu0 %v2829_v52 }
 0x380   : > { %1318 = vmatpush.bf16.xpose.msra.mxu1 %v2828_v51 }
 0x385   : > { %1307 = vmatpush.bf16.xpose.msrb.mxu0 %v2831_v34 }
 0x388   : > { %1319 = vmatpush.bf16.xpose.msra.mxu1 %v2830_v61 }
 0x38c   : > { %1308 = vmatmul.bf16.vlgmr.msrb.gmra.mxu0 %v1238_v30 }
 0x390   : > { %1320 = vmatpush.bf16.xpose.msra.mxu1 %v2832_v45 }
 0x398   : > { %1321 = vmatpush.bf16.xpose.msra.mxu1 %v2833_v17 }
 0x39f   : > { %1322 = vmatmul.bf16.vlgmr.msra.gmra.mxu1 %v1239_v43 }
 0x3c9   : > { %v1281_v16 = vpop.f32.mrf.mxu0 }
 0x3d1   : > { %v1283_v32 = vpop.f32.mrf.mxu0 }
 0x3e2   : > { %v1295_v42 = vpop.f32.mrf.mxu1 }
 0x3e3   : > { %v1296_v38 = vadd.f32 %v1295_v42, %v1281_v16 }
 0x3e5   : > { %v1330_v63 = vmul.f32 %v1329_v5, %v1296_v38 }
 0x3e7   : > { %v1334_v50 = vadd.f32 %v1709_v55, %v1330_v63 }
 0x3e9   : > { %1338 = vst [vmem:[%s326_s22] sm:$0xff] %v1334_v50 }
 0x3ea   : > { %v1297_v21 = vpop.f32.mrf.mxu1 }
 0x3eb   : > { %v1298_v53 = vadd.f32 %v1297_v21, %v1283_v32 }
 0x3ed   : > { %v1332_v9 = vmul.f32 %v1329_v5, %v1298_v53 }
 0x3ef   : > { %v1336_v10 = vadd.f32 %v1710_v20, %v1332_v9 }
 0x3f1   : > { %1340 = vst [vmem:[%s326_s22 + $0x10] sm:$0xff] %v1336_v10 }
 0x409   : > { %v1309_v54 = vpop.f32.mrf.mxu0 }
 0x411   : > { %v1311_v41 = vpop.f32.mrf.mxu0 }
 0x41c   : > { %v1323_v1 = vpop.f32.mrf.mxu1 }
 0x41d   : > { %v1324_v48 = vadd.f32 %v1323_v1, %v1309_v54 }
 0x41f   : > { %v1331_v47 = vmul.f32 %v1329_v5, %v1324_v48 }
 0x421   : > { %v1335_v33 = vadd.f32 %v1711_v14, %v1331_v47 }
 0x423   : > { %1339 = vst [vmem:[%s326_s22 + $0x8] sm:$0xff] %v1335_v33 }
 0x424   : > { %v1325_v0 = vpop.f32.mrf.mxu1 }
 0x425   : > { %v1326_v29 = vadd.f32 %v1325_v0, %v1311_v41 }
 0x427   : > { %v1333_v2 = vmul.f32 %v1329_v5, %v1326_v29 }
 0x429   : > { %v1337_v46 = vadd.f32 %v1712_v37, %v1333_v2 }
 0x42b   : > { %1341 = vst [vmem:[%s326_s22 + $0x18] sm:$0xff] %v1337_v46 }
 0x42c   : > { %1770 = shalt.err (!%p1767_p4)
}
 0x42d   : > { %s1814_s27 = smov 256   ;;  %s1815_s21 = smov 16  }
 0x42e   : > { %1525 = dma.vmem_to_hbm [thread:$0]  (%p1914_p11), %s1356_s20, 512, %s1358_s25, %s1343_s7, %s1814_s27, %s1814_s27, %s1815_s21  }
 0x42f PF: > { %s1372_s22 = sand.u32 1, %s1797_s29   ;;  %p2834_p7 = scmp.ge.s32.totalorder %s1809_s10, 2 }
 0x430   : > { %s1373_s23 = scalar_lea.sflag [#allocation5], %s1372_s22 }
 0x431   : > { %p1532_p5 = pnand %p2834_p7, %p1918_p12 }
 0x433   : > { %p1533_p8 = pneg %p1532_p5 }
 0x435   : > { %1792 = dma.done.wait (%p1533_p8), %s1373_s23, 512  }
 0x436   : > { %1794 = vsyncadd (%p1533_p8), %s1373_s23, 4294966784  ;;  %s2835_s15 = sld [smem:[#allocation9_spill]]  ;;  %p22_p10 = scmp.ge.s32.totalorder %s1889_s12, 4  }
 0x437   : > { %s2836_s29 = smov %s1801_s30  ;;  %s2837_s30 = smov %s1805_s9 }
 0x438   : > { %s2839_s10 = smov %s1889_s12  ;;  %24 = sbr.rel (!%p22_p10) target bundleno = 7 (0x7), region = 97 }
 0x43c   : > { %s2838_s9 = smov %s2835_s15 }
 0x43d   :  { %1379 = vsyncpa [#allocation4], 1 }
 0x43e   :  { %1381 = vsyncpa [#allocation4 + $0x1], 1 }
 0x43f   :  { %1382 = vsyncpa [#allocation5], 1 }
 0x440   :  { %1384 = vsyncpa [#allocation5 + $0x1], 1 }

</bundles_post_ra>
